<compile_context>
chip_gen: v7x
topology: tpu7x:2x2x1
jax: 0.10.0
libtpu: 0.0.40
codegen_flags: <defaults>
</compile_context>

<pallas_src>
import jax
import jax.numpy as jnp
from jax.experimental import pallas as pl
from jax.experimental.pallas import tpu as pltpu


def _noise_injection_kernel(img_ref, noise_ref, w_ref, out_ref):
    # img_ref:   (TB, C, THW)  image tile
    # noise_ref: (TB, 1, THW)  noise tile (broadcast over C / sublanes)
    # w_ref:     (1,  C, 1)    per-channel weight (broadcast over batch & lanes)
    # out_ref:   (TB, C, THW)
    out_ref[...] = img_ref[...] + w_ref[...] * noise_ref[...]


def _cdiv(a, b):
    return -(-a // b)


def _round_up(x, m):
    return _cdiv(x, m) * m


def _largest_divisor_leq(n, k):
    k = max(1, min(n, k))
    for d in range(k, 0, -1):
        if n % d == 0:
            return d
    return 1


def _select_tiling(N, C, HW, itemsize, vmem_budget_bytes):
    """Pick (TB, thw, num_hw): batch tile, lane tile, number of HW tiles."""
    # Double-buffered bytes per lane per batch element: 2 * (img + out + noise).
    per_lane = 2 * (2 * C + 1) * itemsize
    max_thw = max(128, (vmem_budget_bytes // per_lane) // 128 * 128)

    if HW <= max_thw:
        # Full-extent lane block: equals the array dim, so the (8,128) rule is
        # satisfied even when HW % 128 != 0 (a few masked vst.msk stores only).
        thw = HW
        num_hw = 1
    else:
        # Balanced lane-dense tiles; overshoot is < 128 lanes per row.
        num_hw = _cdiv(HW, max_thw)
        thw = _round_up(_cdiv(HW, num_hw), 128)
        num_hw = _cdiv(HW, thw)

    # Batch tile: aim for >= ~1 MiB image blocks to amortize per-step grid
    # overhead, staying under the double-buffered VMEM budget. TB divides N so
    # the batch axis has no ragged blocks.
    img_block_bytes = max(1, C * thw * itemsize)
    tb_perf = max(1, _cdiv(1 << 20, img_block_bytes))
    tb_cap = max(1, vmem_budget_bytes // max(1, 2 * (2 * C + 1) * thw * itemsize))
    TB = _largest_divisor_leq(N, min(tb_perf, tb_cap))

    # Guarantee >= 2 parallel grid steps when possible (v7x megacore: both
    # TensorCores get work).
    if (N // TB) * num_hw == 1:
        if N >= 2:
            TB = _largest_divisor_leq(N, max(1, N // 2))
        elif HW >= 256:
            thw = _round_up(_cdiv(HW, 2), 128)
            num_hw = _cdiv(HW, thw)

    return TB, thw, num_hw


def noise_injection(image, noise, weight, *,
                    vmem_budget_bytes=12 * 1024 * 1024,
                    donate_image=False):
    """image: (N, C, H, W), noise: (N, 1, H, W), weight: (1, C, 1, 1)."""
    N, C, H, W = image.shape
    HW = H * W
    itemsize = jnp.dtype(image.dtype).itemsize

    TB, thw, num_hw = _select_tiling(N, C, HW, itemsize, vmem_budget_bytes)
    n_tiles = N // TB

    # Pure reshapes — no padding, no extra HBM passes.
    img_f = image.reshape(N, C, HW)
    noise_f = noise.reshape(N, 1, HW)
    w_f = weight.reshape(1, C, 1).astype(image.dtype)

    # Double-buffered VMEM footprint for this tiling; raise the scoped limit
    # above v5e's 16 MiB default but never past 32 MiB (v7x has 64 MiB/TC).
    footprint = 2 * TB * (2 * C + 1) * thw * itemsize + C * itemsize
    vmem_limit = int(min(max(2 * footprint, 16 * 1024 * 1024), 32 * 1024 * 1024))

    cost = pl.CostEstimate(
        flops=2 * N * C * HW,                                   # one mul + one add per element
        transcendentals=0,
        bytes_accessed=(2 * N * C * HW + N * HW + C) * itemsize,
    )

    out_f = pl.pallas_call(
        _noise_injection_kernel,
        out_shape=jax.ShapeDtypeStruct((N, C, HW), image.dtype),
        grid_spec=pltpu.PrefetchScalarGridSpec(
            num_scalar_prefetch=0,
            grid=(n_tiles, num_hw),
            in_specs=[
                pl.BlockSpec((TB, C, thw), lambda n, h: (n, 0, h)),   # image
                pl.BlockSpec((TB, 1, thw), lambda n, h: (n, 0, h)),   # noise
                pl.BlockSpec((1, C, 1), lambda n, h: (0, 0, 0)),      # weight
            ],
            out_specs=pl.BlockSpec((TB, C, thw), lambda n, h: (n, 0, h)),
        ),
        compiler_params=pltpu.CompilerParams(
            dimension_semantics=("parallel", "parallel"),
            vmem_limit_bytes=vmem_limit,
        ),
        cost_estimate=cost,
        input_output_aliases=({0: 0} if donate_image else {}),
    )(img_f, noise_f, w_f)

    return out_f.reshape(N, C, H, W)


if __name__ == "__main__":
    key = jax.random.PRNGKey(0)
    k_img, k_noise, k_w = jax.random.split(key, 3)

    # Small shapes consistent with the module's forward.
    N, C, H, W = 2, 4, 16, 16
    image = jax.random.normal(k_img, (N, C, H, W), dtype=jnp.float32)
    noise = jax.random.normal(k_noise, (N, 1, H, W), dtype=jnp.float32)

    # PyTorch init is torch.zeros(1, C, 1, 1); use deterministic non-zero
    # values here so the noise path is actually exercised.
    weight = jax.random.normal(k_w, (1, C, 1, 1), dtype=jnp.float32) * 0.1

    out = jax.block_until_ready(noise_injection(image, noise, weight))
    ref = image + weight * noise
    assert out.shape == (N, C, H, W)
    assert jnp.allclose(out, ref, atol=1e-6, rtol=1e-6)

    # Non-multiple-of-128 HW (full-extent lane block, masked edge stores).
    H2, W2 = 7, 7
    image2 = jax.random.normal(k_img, (N, C, H2, W2), dtype=jnp.float32)
    noise2 = jax.random.normal(k_noise, (N, 1, H2, W2), dtype=jnp.float32)
    out2 = jax.block_until_ready(noise_injection(image2, noise2, weight))
    ref2 = image2 + weight * noise2
    assert out2.shape == (N, C, H2, W2)
    assert jnp.allclose(out2, ref2, atol=1e-6, rtol=1e-6)

    # N == 1 forces an HW split (>= 2 parallel steps) with a ragged last
    # block -> exercises OOB-masked stores on the lane-tiled path.
    N3, H3, W3 = 1, 20, 20
    image3 = jax.random.normal(k_img, (N3, C, H3, W3), dtype=jnp.float32)
    noise3 = jax.random.normal(k_noise, (N3, 1, H3, W3), dtype=jnp.float32)
    out3 = jax.block_until_ready(noise_injection(image3, noise3, weight))
    ref3 = image3 + weight * noise3
    assert out3.shape == (N3, C, H3, W3)
    assert jnp.allclose(out3, ref3, atol=1e-6, rtol=1e-6)

    print("KERNEL_OK")
</pallas_src>

<mosaic_0001>
module attributes {stable_mosaic.version = 11 : i64} {
  func.func @_noise_injection_kernel(%arg0: i32, %arg1: i32, %arg2: memref<1x4x256xf32, #tpu.memory_space<vmem>>, %arg3: memref<1x1x256xf32, #tpu.memory_space<vmem>>, %arg4: memref<1x4x1xf32, #tpu.memory_space<vmem>>, %arg5: memref<1x4x256xf32, #tpu.memory_space<vmem>>) attributes {dimension_semantics = [#tpu.dimension_semantics<parallel>, #tpu.dimension_semantics<parallel>], iteration_bounds = array<i64: 2, 1>, scalar_prefetch = 0 : i64, scratch_operands = 0 : i64, tpu.core_type = #tpu.core_type<tc>, window_params = [{transform_indices = @transform_0, window_bounds = array<i64: 1, 4, 256>}, {transform_indices = @transform_1, window_bounds = array<i64: 1, 1, 256>}, {pipeline_mode = #tpu.pipeline_mode<synchronous>, transform_indices = @transform_2, window_bounds = array<i64: 1, 4, 1>}, {transform_indices = @transform_3, window_bounds = array<i64: 1, 4, 256>}]} {
    %c0 = arith.constant 0 : index
    %c0_0 = arith.constant 0 : index
    %c0_1 = arith.constant 0 : index
    %0 = vector.load %arg2[%c0, %c0_0, %c0_1] : memref<1x4x256xf32, #tpu.memory_space<vmem>>, vector<1x4x256xf32>
    %c0_2 = arith.constant 0 : index
    %c0_3 = arith.constant 0 : index
    %c0_4 = arith.constant 0 : index
    %1 = vector.load %arg4[%c0_2, %c0_3, %c0_4] : memref<1x4x1xf32, #tpu.memory_space<vmem>>, vector<1x4x1xf32>
    %c0_5 = arith.constant 0 : index
    %c0_6 = arith.constant 0 : index
    %c0_7 = arith.constant 0 : index
    %2 = vector.load %arg3[%c0_5, %c0_6, %c0_7] : memref<1x1x256xf32, #tpu.memory_space<vmem>>, vector<1x1x256xf32>
    %3 = vector.broadcast %1 : vector<1x4x1xf32> to vector<1x4x256xf32>
    %4 = vector.broadcast %2 : vector<1x1x256xf32> to vector<1x4x256xf32>
    %5 = arith.mulf %3, %4 : vector<1x4x256xf32>
    %6 = arith.addf %0, %5 : vector<1x4x256xf32>
    %c0_8 = arith.constant 0 : index
    %c0_9 = arith.constant 0 : index
    %c0_10 = arith.constant 0 : index
    %7 = vector.load %arg5[%c0_8, %c0_9, %c0_10] : memref<1x4x256xf32, #tpu.memory_space<vmem>>, vector<1x4x256xf32>
    tpu.vector_store %arg5[%c0_8, %c0_9, %c0_10], %6 {strides = array<i32>} : memref<1x4x256xf32, #tpu.memory_space<vmem>>, vector<1x4x256xf32>,
    return
  }
  func.func @transform_0(%arg0: i32, %arg1: i32) -> (i32, i32, i32) {
    %c0_i32 = arith.constant 0 : i32
    %c0_i32_0 = arith.constant 0 : i32
    return %arg0, %c0_i32, %arg1 : i32, i32, i32
  }
  func.func @transform_1(%arg0: i32, %arg1: i32) -> (i32, i32, i32) {
    %c0_i32 = arith.constant 0 : i32
    %c0_i32_0 = arith.constant 0 : i32
    return %arg0, %c0_i32, %arg1 : i32, i32, i32
  }
  func.func @transform_2(%arg0: i32, %arg1: i32) -> (i32, i32, i32) {
    %c0_i32 = arith.constant 0 : i32
    %c0_i32_0 = arith.constant 0 : i32
    %c0_i32_1 = arith.constant 0 : i32
    %c0_i32_2 = arith.constant 0 : i32
    return %c0_i32, %c0_i32_0, %c0_i32_1 : i32, i32, i32
  }
  func.func @transform_3(%arg0: i32, %arg1: i32) -> (i32, i32, i32) {
    %c0_i32 = arith.constant 0 : i32
    %c0_i32_0 = arith.constant 0 : i32
    return %arg0, %c0_i32, %arg1 : i32, i32, i32
  }
}

</mosaic_0001>

<bundles_post_ra>
// kernel: tpu_custom_call.1
= control target key start
LH: loop header
LB: loop body
LE: loop exit
PB: predicated region body
PF: predicated region fallthrough
CT: control target
= control target key end

     0   :  { %8 = vsyncpa [#allocation3], 0  ;;  %s782_s0 = inlined_call_operand.hbm [shape: f32[2,4,256], index: 0, kind: input, shape index: {}]   ;;  %s783_s1 = inlined_call_operand.vmem [shape: f32[2,1,256], index: 1, kind: input, shape index: {}]   ;;  %s784_s2 = inlined_call_operand.vmem [shape: f32[1,4,1], index: 2, kind: input, shape index: {}]   ;;  %s785_s3 = inlined_call_operand.hbm [shape: f32[2,4,256], index: 3, kind: output, shape index: {}]  }
   0x1   :  { %10 = vsyncpa [#allocation3 + $0x1], 0 }
   0x2   :  { %11 = vsyncpa [#allocation4], 0 }
   0x3   :  { %13 = vsyncpa [#allocation4 + $0x1], 0  ;;  %s602_s12 = smov 0   ;;  %s604_s13 = smov 0  }
   0x4   :  { %s606_s14 = smov 0   ;;  %s608_s15 = smov 0  }
   0x5   :  { %s610_s16 = smov 0   ;;  %s612_s17 = smov 0  }
   0x6 LB: > { %s383_s18 = sadd.s32 4294967295, %s577_s17   ;;  %s384_s19 = sadd.s32 4294967294, %s577_s17   ;;  %s577_s17 = sphi %s612_s17, %s19_s17   ;;  %s573_s16 = sphi %s610_s16, %s801_s16   ;;  %s569_s15 = sphi %s608_s15, %s800_s15   ;;  %s565_s14 = sphi %s606_s14, %s799_s14   ;;  %s561_s13 = sphi %s604_s13, %s798_s13   ;;  %s557_s12 = sphi %s602_s12, %s797_s12  }
   0x7   : > { %s31_s20 = sadd.s32 1, %s573_s16  ;;  %s40_s21 = sadd.s32 1, %s565_s14 }
   0x8   : > { %p33_p0 = scmp.ge.s32.totalorder %s31_s20, 2  ;;  %p47_p1 = scmp.ne.s32.totalorder %s565_s14, %s561_s13 }
   0x9   : > { %p48_p2 = scmp.eq.s32.totalorder %s577_s17, 0  ;;  %p53_p3 = scmp.ne.s32.totalorder %s561_s13, %s557_s12 }
   0xa   : > { %s803_s20 = smov (%p33_p0, %s31_s20), 0  ;;  %p54_p5 = scmp.eq.s32.totalorder %s383_s18, 0 }
   0xb   : > { %p643_p4 = por %p48_p2, %p47_p1  ;;  %s35_s23 = ssub.s32 %s573_s16, %s803_s20 }
   0xc   : > { %p128_p6 = scmp.eq.s32.totalorder %s383_s18, 1  ;;  %p38_p7 = scmp.eq.s32.totalorder %s35_s23, 0 }
   0xd   : > { %p649_p8 = por %p54_p5, %p53_p3  ;;  %p134_p10 = scmp.eq.s32.totalorder %s384_s19, 1 }
   0xe   : > { %p653_p9 = por %p128_p6, %p47_p1  ;;  %p413_p13 = scmp.lt.s32.totalorder %s577_s17, 2 }
   0xf   : > { %s658_s26 = scalar_select %p38_p7, %s565_s14, %s40_s21  }
  0x10   : > { %s789_s25 = scalar_select %p653_p9, 1, 0 }
  0x11   : > { %p660_p11 = por %p134_p10, %p53_p3  ;;  %s157_s28 = sand.u32 1, %s565_s14  }
  0x12   : > { %s387_s29 = sshll.u32 %s157_s28, 3  ;;  %s399_s30 = sshll.u32 %s573_s16, 7 }
  0x13   : > { %s790_s27 = scalar_select %p660_p11, 1, 0 }
  0x14   : > { %s671_s6 = scalar_lea.hbm %s782_s0, %s399_s30  ;;  %s161_s7 = scalar_lea.vmem [#allocation2], %s387_s29 }
  0x15   : > { %s171_s8 = sshll.u32 %s161_s7, 4  ;;  %p677_p0 = pnand %p413_p13, %p643_p4  ;;  %s673_s8 = int_to_ptr.vmem [resolvable:$true] %s171_s8 }
  0x16   : > { %s158_s10 = scalar_lea.sflag [#allocation3], %s157_s28  ;;  %s465_s11 = scalar_lea.hbm %s671_s6, 128 }
  0x17   : > { %p466_p3 = scmp.ne.s32.totalorder %s671_s6, %s465_s11  ;;  %p467_p5 = pneg %p677_p0 }
  0x18   : > { %s470_s21 = scalar_lea.hbm %s782_s0, 256  ;;  %p471_p4 = scmp.lt.u32.totalorder %s671_s6, %s782_s0 }
  0x19   : > { %p468_p6 = pnand %p467_p5, %p466_p3  ;;  %p472_p10 = scmp.lt.u32.totalorder %s470_s21, %s465_s11 }
  0x1a   : > { %p474_p12 = scmp.lt.u32.totalorder %s465_s11, %s671_s6 }
  0x1b   : > { %p469_p7 = pneg %p468_p6  ;;  %p473_p13 = por %p472_p10, %p471_p4 }
  0x1d   : > { %p475_p1 = por %p474_p12, %p473_p13 }
  0x1f   : > { %p476_p2 = pnand %p475_p1, %p469_p7 }
  0x21   : > { %479 = shalt.err (!%p476_p2)
}
  0x22   : > { %s480_s28 = scalar_lea.vmem %s673_s8, 128  ;;  %s579_s29 = smov [#allocation2]  }
  0x23   : > { %p481_p3 = scmp.ne.s32.totalorder %s673_s8, %s480_s28  ;;  %s485_s30 = sshll.u32 %s579_s29, 4  ;;  %s486_s30 = int_to_ptr.vmem [resolvable:$false] %s485_s30 }
  0x24   : > { %s487_s4 = scalar_lea.vmem %s486_s30, 256  ;;  %p488_p9 = scmp.lt.s32.totalorder %s673_s8, %s486_s30 }
  0x25   : > { %p483_p6 = pnand %p481_p3, %p467_p5  ;;  %p489_p4 = scmp.lt.s32.totalorder %s487_s4, %s480_s28 }
  0x27   : > { %p484_p11 = pneg %p483_p6  ;;  %p490_p10 = por %p489_p4, %p488_p9 }
  0x29   : > { %p491_p12 = pnand %p490_p10, %p484_p11 }
  0x2b   : > { %494 = shalt.err (!%p491_p12)
}
  0x2c   : > { %408 = dma.hbm_to_vmem [thread:$0]  (!%p677_p0), %s671_s6, 128, %s673_s8, %s158_s10  }
  0x2d   : > { %p792_p1 = scmp.lt.s32.totalorder %s577_s17, 3  ;;  %p793_p2 = scmp.ge.s32.totalorder %s577_s17, 1 }
  0x2f   : > { %p189_p5 = pnand %p793_p2, %p792_p1 }
  0x30   : > { %s713_s5 = sand.u32 (!%p189_p5), 1, %s561_s13  }
  0x31   : > { %192 = sbr.rel (%p189_p5) target bundleno = 207 (0xcf), region = 32  ;;  %s391_s7 = sshll.u32 (!%p189_p5), %s713_s5, 3 }
  0x32   : > { %s195_s11 = scalar_lea.sflag (!%p189_p5), [#allocation3], %s713_s5  ;;  %s198_s18 = scalar_lea.vmem (!%p189_p5), [#allocation2], %s391_s7 }
  0x38   : > { %548 = dma.done.wait (%p649_p8), %s195_s11, 128  }
  0x39   : > { %550 = vsyncadd (%p649_p8), %s195_s11, 4294967168  ;;  %v580_v0 = vmov 0   ;;  %v241_v1 = vld [vmem:[%s784_s2] sm:$0xf]  ;;  %p231_p9 = scmp.lt.s32.totalorder %s569_s15, 1  ;;  %v249_v2 = vlaneseq  ;;  %s400_s22 = sshll.u32 %s569_s15, 7 }
  0x3a   : > { %464 = vset.pattern.permute.xlu0 %v580_v0  ;;  %v240_v12 = vld [vmem:[%s198_s18] sm:$0xff]  ;;  %s228_s23 = scalar_lea.vmem [#allocation5], %s391_s7  ;;  %s733_s4 = scalar_lea.hbm %s785_s3, %s400_s22 }
  0x3b   : > { %245 = vperm.xlu0 %464, %v241_v1   ;;  %s232_s9 = scalar_select %p231_p9, %s569_s15, 1  ;;  %v250_v3 = vshrl.u32 %v249_v2, 7 }
  0x3c   : > { %s284_s28 = sshll.u32 %s228_s23, 4  ;;  %s268_s11 = scalar_lea.sflag [#allocation4], %s713_s5  ;;  %s735_s28 = int_to_ptr.vmem [resolvable:$true] %s284_s28 }
  0x3d   : > { %s393_s10 = sshll.u32 %s232_s9, 1  ;;  %v251_v4 = vsub.s32 0, %v250_v3  ;;  %v255_v5 = vsub.s32 1, %v250_v3  ;;  %s495_s6 = scalar_lea.vmem %s735_s28, 128 }
  0x3e   : > { %s237_s24 = scalar_lea.vmem %s783_s1, %s393_s10  ;;  %p496_p8 = scmp.ne.s32.totalorder %s735_s28, %s495_s6 }
  0x3f   : > { %v242_v6 = vld [vmem:[%s237_s24] sm:$0x3]  ;;  %p794_p11 = scmp.ne.s32.totalorder %s789_s25, 0  ;;  %s581_s15 = smov [#allocation5]  }
  0x40   : > { %v252_v7 = vrot.slane %v242_v6, %v251_v4  ;;  %v256_v8 = vrot.slane %v242_v6, %v255_v5  ;;  %s499_s7 = sshll.u32 %s581_s15, 4  ;;  %s500_s7 = int_to_ptr.vmem [resolvable:$false] %s499_s7 }
  0x41   : > { %p497_p0 = pnand %p496_p8, %p794_p11  ;;  %s501_s18 = scalar_lea.vmem %s500_s7, 256 }
  0x42   : > { %p502_p13 = scmp.lt.s32.totalorder %s735_s28, %s500_s7  ;;  %p503_p3 = scmp.lt.s32.totalorder %s501_s18, %s495_s6 }
  0x43   : > { %p498_p7 = pneg %p497_p0 }
  0x44   : > { %p504_p6 = por %p503_p3, %p502_p13 }
  0x46   : > { %p505_p4 = pnand %p504_p6, %p498_p7 }
  0xba   : > { %v246_v9 = vpop.permute.xlu0 %245 }
  0xbb   : > { %v259_v10 = vmul.f32 %v252_v7, %v246_v9  ;;  %v260_v11 = vmul.f32 %v256_v8, %v246_v9 }
  0xbd   : > { %v263_v13 = vcombine.low %v259_v10, %v260_v11 }
  0xbf   : > { %v265_v14 = vadd.f32 %v263_v13, %v240_v12 }
  0xc1   : > { %266 = vst [vmem:[%s228_s23] sm:$0xff] %v265_v14 }
  0xc2   : > { %508 = shalt.err (!%p505_p4)
}
  0xc3   : > { %s509_s5 = scalar_lea.hbm %s733_s4, 128  ;;  %s513_s10 = scalar_lea.hbm %s785_s3, 256 }
  0xc4   : > { %p510_p10 = scmp.ne.s32.totalorder %s733_s4, %s509_s5  ;;  %p514_p2 = scmp.lt.u32.totalorder %s733_s4, %s785_s3 }
  0xc5   : > { %p515_p5 = scmp.lt.u32.totalorder %s513_s10, %s509_s5  ;;  %p517_p8 = scmp.lt.u32.totalorder %s509_s5, %s733_s4 }
  0xc6   : > { %p511_p12 = pnand %p510_p10, %p794_p11 }
  0xc7   : > { %p516_p9 = por %p515_p5, %p514_p2 }
  0xc8   : > { %p512_p1 = pneg %p511_p12 }
  0xc9   : > { %p518_p0 = por %p517_p8, %p516_p9 }
  0xcb   : > { %p519_p7 = pnand %p518_p0, %p512_p1 }
  0xcd   : > { %522 = shalt.err (!%p519_p7)
}
  0xce   : > { %403 = dma.vmem_to_hbm [thread:$0]  (%p794_p11), %s735_s28, 128, %s733_s4, %s268_s11  }
  0xcf PF: > { %s296_s24 = sand.u32 1, %s557_s12   ;;  %p795_p13 = scmp.ne.s32.totalorder %s790_s27, 0 }
  0xd0   : > { %p796_p3 = scmp.ge.s32.totalorder %s577_s17, 2  ;;  %s297_s22 = scalar_lea.sflag [#allocation4], %s296_s24 }
  0xd2   : > { %p410_p6 = pnand %p796_p3, %p795_p13 }
  0xd4   : > { %552 = dma.done.wait (!%p410_p6), %s297_s22, 128  }
  0xd5   : > { %554 = vsyncadd (!%p410_p6), %s297_s22, 4294967168  ;;  %s19_s17 = sadd.s32 1, %s577_s17   ;;  %s797_s12 = smov %s561_s13 }
  0xd6   : > { %p16_p4 = scmp.ge.s32.totalorder %s19_s17, 4   ;;  %s798_s13 = smov %s565_s14 }
  0xd7   : > { %s799_s14 = smov %s658_s26  ;;  %s800_s15 = smov %s573_s16 }
  0xd8   : > { %s801_s16 = smov %s803_s20  ;;  %18 = sbr.rel (!%p16_p4) target bundleno = 6 (0x6), region = 80 }
  0xdf   :  { %302 = vsyncpa [#allocation3], 1 }
  0xe0   :  { %304 = vsyncpa [#allocation3 + $0x1], 1 }
  0xe1   :  { %305 = vsyncpa [#allocation4], 1 }
  0xe2   :  { %307 = vsyncpa [#allocation4 + $0x1], 1 }

</bundles_post_ra>
